<compile_context>
chip_gen: v5e
topology: v5e:2x2
jax: 0.10.0
libtpu: 0.0.40
codegen_flags: <defaults>
</compile_context>

<pallas_src>
import math

import jax
import jax.numpy as jnp
from jax.experimental import pallas as pl
from jax.experimental.pallas import tpu as pltpu


# ---------------------------------------------------------------------------
# Fused MLP kernel: o = relu(x @ Wt + b)
# ---------------------------------------------------------------------------
def _mlp_kernel(x_ref, wt_ref, b_ref, o_ref):
    acc = jnp.dot(x_ref[...], wt_ref[...], preferred_element_type=jnp.float32)
    o_ref[...] = jnp.maximum(acc + b_ref[...], 0.0)


def _pick_row_tile(m, k, n, budget_bytes=8 << 20):
    """Largest row tile (full M if everything fits) keeping operands in VMEM."""
    full_bytes = (m * k + k * n + n + m * n) * 4
    if full_bytes <= budget_bytes:
        return m  # single full-array block: no pipelining overhead
    for tm in (1024, 512, 256, 128, 64, 32, 16, 8):
        if m % tm == 0 and (tm * k + k * n + n + tm * n) * 4 <= budget_bytes:
            return tm
    return m  # fall back to a single block (shapes here are always small)


def mlp_forward(x, w_t, b_row):
    """x: any shape with trailing dims flattening to in_dims.
    w_t: (in_dims, out_dims) pre-transposed weight.  b_row: (1, out_dims)."""
    k, n = w_t.shape
    x2 = x.reshape(-1, k).astype(w_t.dtype)   # x.reshape(-1, in_dims); type_as(weight)
    m = x2.shape[0]

    tm = _pick_row_tile(m, k, n)
    grid = (m // tm,)

    return pl.pallas_call(
        _mlp_kernel,
        out_shape=jax.ShapeDtypeStruct((m, n), w_t.dtype),
        grid=grid,
        in_specs=[
            pl.BlockSpec((tm, k), lambda i: (i, 0)),
            pl.BlockSpec((k, n), lambda i: (0, 0)),
            pl.BlockSpec((1, n), lambda i: (0, 0)),
        ],
        out_specs=pl.BlockSpec((tm, n), lambda i: (i, 0)),
        compiler_params=pltpu.CompilerParams(
            dimension_semantics=("parallel",),
        ),
    )(x2, w_t, b_row)


# ---------------------------------------------------------------------------
# Deterministic parameter init mirroring the PyTorch module:
#   weight ~ U(-stdv, stdv) with stdv = 1/sqrt(in_dims); bias = 0.
# Weight is generated directly in the pre-transposed (in_dims, out_dims)
# layout, which is distribution-equivalent to transposing a (out, in) draw.
# ---------------------------------------------------------------------------
def init_params(key, in_dims, out_dims):
    stdv = 1.0 / math.sqrt(in_dims)
    w_t = jax.random.uniform(key, (in_dims, out_dims), jnp.float32, -stdv, stdv)
    b_row = jnp.zeros((1, out_dims), jnp.float32)
    return {"w_t": w_t, "b_row": b_row}


# ---------------------------------------------------------------------------
# Pure-JAX reference for a correctness check
# ---------------------------------------------------------------------------
def reference_forward(x, w_t, b_row):
    x2 = x.reshape(-1, w_t.shape[0]).astype(w_t.dtype)
    return jnp.maximum(x2 @ w_t + b_row, 0.0)


if __name__ == "__main__":
    key = jax.random.PRNGKey(0)
    k_x, k_p = jax.random.split(key)

    # Small shapes consistent with MLP.forward's reshape(-1, in_dims):
    # x is (batch, seq, in_dims) -> flattened to (batch*seq, in_dims).
    batch, seq, in_dims, out_dims = 2, 8, 32, 64
    x = jax.random.normal(k_x, (batch, seq, in_dims), jnp.float32)
    params = init_params(k_p, in_dims, out_dims)

    fwd = jax.jit(lambda xx, p: mlp_forward(xx, p["w_t"], p["b_row"]))
    out = fwd(x, params)
    jax.block_until_ready(out)

    assert out.shape == (batch * seq, out_dims)

    ref = reference_forward(x, params["w_t"], params["b_row"])
    assert jnp.allclose(out, ref, rtol=1e-5, atol=1e-5), "MLP output mismatch"

    print("KERNEL_OK")
</pallas_src>

<mosaic_0001>
module attributes {stable_mosaic.version = 11 : i64} {
  func.func @_mlp_kernel(%arg0: i32, %arg1: memref<16x32xf32, #tpu.memory_space<vmem>>, %arg2: memref<32x64xf32, #tpu.memory_space<vmem>>, %arg3: memref<1x64xf32, #tpu.memory_space<vmem>>, %arg4: memref<16x64xf32, #tpu.memory_space<vmem>>) attributes {dimension_semantics = [#tpu.dimension_semantics<parallel>], iteration_bounds = array<i64: 1>, scalar_prefetch = 0 : i64, scratch_operands = 0 : i64, tpu.core_type = #tpu.core_type<tc>, window_params = [{transform_indices = @transform_0, window_bounds = array<i64: 16, 32>}, {pipeline_mode = #tpu.pipeline_mode<synchronous>, transform_indices = @transform_1, window_bounds = array<i64: 32, 64>}, {pipeline_mode = #tpu.pipeline_mode<synchronous>, transform_indices = @transform_2, window_bounds = array<i64: 1, 64>}, {transform_indices = @transform_3, window_bounds = array<i64: 16, 64>}]} {
    %c0 = arith.constant 0 : index
    %c0_0 = arith.constant 0 : index
    %0 = vector.load %arg1[%c0, %c0_0] : memref<16x32xf32, #tpu.memory_space<vmem>>, vector<16x32xf32>
    %c0_1 = arith.constant 0 : index
    %c0_2 = arith.constant 0 : index
    %1 = vector.load %arg2[%c0_1, %c0_2] : memref<32x64xf32, #tpu.memory_space<vmem>>, vector<32x64xf32>
    %cst = arith.constant dense<0.000000e+00> : vector<16x64xf32>
    %2 = tpu.matmul %0, %1, %cst {dimension_numbers = #tpu.dot_dimension_numbers<[1], [0], [0], [1], [0, 0, 1, 1], [], []>} : vector<16x32xf32>, vector<32x64xf32>, vector<16x64xf32> -> vector<16x64xf32>
    %c0_3 = arith.constant 0 : index
    %c0_4 = arith.constant 0 : index
    %3 = vector.load %arg3[%c0_3, %c0_4] : memref<1x64xf32, #tpu.memory_space<vmem>>, vector<1x64xf32>
    %4 = vector.broadcast %3 : vector<1x64xf32> to vector<16x64xf32>
    %5 = arith.addf %2, %4 : vector<16x64xf32>
    %cst_5 = arith.constant 0.000000e+00 : f32
    %6 = vector.broadcast %cst_5 : f32 to vector<16x64xf32>
    %7 = arith.maximumf %5, %6 : vector<16x64xf32>
    %c0_6 = arith.constant 0 : index
    %c0_7 = arith.constant 0 : index
    %8 = vector.load %arg4[%c0_6, %c0_7] : memref<16x64xf32, #tpu.memory_space<vmem>>, vector<16x64xf32>
    tpu.vector_store %arg4[%c0_6, %c0_7], %7 {strides = array<i32>} : memref<16x64xf32, #tpu.memory_space<vmem>>, vector<16x64xf32>,
    return
  }
  func.func @transform_0(%arg0: i32) -> (i32, i32) {
    %c0_i32 = arith.constant 0 : i32
    %c0_i32_0 = arith.constant 0 : i32
    return %arg0, %c0_i32 : i32, i32
  }
  func.func @transform_1(%arg0: i32) -> (i32, i32) {
    %c0_i32 = arith.constant 0 : i32
    %c0_i32_0 = arith.constant 0 : i32
    %c0_i32_1 = arith.constant 0 : i32
    return %c0_i32, %c0_i32_0 : i32, i32
  }
  func.func @transform_2(%arg0: i32) -> (i32, i32) {
    %c0_i32 = arith.constant 0 : i32
    %c0_i32_0 = arith.constant 0 : i32
    %c0_i32_1 = arith.constant 0 : i32
    return %c0_i32, %c0_i32_0 : i32, i32
  }
  func.func @transform_3(%arg0: i32) -> (i32, i32) {
    %c0_i32 = arith.constant 0 : i32
    %c0_i32_0 = arith.constant 0 : i32
    return %arg0, %c0_i32 : i32, i32
  }
}

</mosaic_0001>

<bundles_post_ra>
// kernel: _lambda_.1
= control target key start
LH: loop header
LB: loop body
LE: loop exit
PB: predicated region body
PF: predicated region fallthrough
CT: control target
= control target key end

     0   :  { %8 = vsyncpa [#allocation3], 0  ;;  %s248_s0 = inlined_call_operand.hbm [shape: f32[16,32], index: 0, kind: input, shape index: {}]   ;;  %s249_s1 = inlined_call_operand.hbm [shape: f32[32,64], index: 1, kind: input, shape index: {}]   ;;  %s250_s2 = inlined_call_operand.vmem [shape: f32[1,64], index: 2, kind: input, shape index: {}]   ;;  %s251_s3 = inlined_call_operand.hbm [shape: f32[16,64], index: 3, kind: output, shape index: {}]  }
   0x1   :  { %9 = vsyncpa [#allocation6], 0 }
   0x2   :  { %10 = vsyncpa [#allocation4], 0  ;;  %s15_s14 = sshll.u32 %s248_s0, 4  ;;  %s202_s15 = smov [#allocation2]   ;;  %s16_s14 = int_to_ptr.hbm [resolvable:$true] %s15_s14 }
   0x3   :  { %s17_s16 = sshll.u32 %s202_s15, 4  ;;  %s28_s19 = sshll.u32 %s249_s1, 4  ;;  %s18_s16 = int_to_ptr.vmem [resolvable:$true] %s17_s16  ;;  %s29_s19 = int_to_ptr.hbm [resolvable:$true] %s28_s19 }
   0x4   :  { %s203_s20 = smov 128   ;;  %s204_s21 = smov 8  }
   0x5   :  { %23 = dma.hbm_to_vmem [thread:$0]  %s16_s14, 256, %s18_s16, [#allocation3], %s203_s20, %s203_s20, %s204_s21  }
   0x6   :  { %s205_s22 = smov [#allocation5]  }
   0x7   :  { %s30_s23 = sshll.u32 %s205_s22, 4  ;;  %s31_s23 = int_to_ptr.vmem [resolvable:$true] %s30_s23 }
   0x8   :  { %36 = dma.hbm_to_vmem [thread:$0]  %s29_s19, 512, %s31_s23, [#allocation6], %s203_s20, %s203_s20, %s204_s21  }
   0x9   :  { %196 = dma.done.wait [#allocation3], 256  }
   0xa   :  { %197 = vsyncadd [#allocation3], 4294967040 }
   0xb   :  { %198 = dma.done.wait [#allocation6], 512  }
   0xc   :  { %199 = vsyncadd [#allocation6], 4294966784  ;;  %v52_v0 = vld [vmem:[#allocation5 + $0x18] sm:$0xff]  ;;  %v51_v1 = vld [vmem:[#allocation5 + $0x10] sm:$0xff]  ;;  %vm57_vm0 = vcmask 261120   ;;  %s206_s24 = smov [#allocation7]  }
   0xd   :  { %76 = vmatpush.msra.mxu0 %v52_v0  ;;  %114 = vmatpush.msra.mxu1 %v52_v0  ;;  %v50_v2 = vld [vmem:[#allocation5 + $0x8] sm:$0xff]  ;;  %v49_v3 = vld [vmem:[#allocation5] sm:$0xff]  ;;  %v47_v4 = vld [vmem:[#allocation2] sm:$0xff]  ;;  %s96_s25 = sshll.u32 %s206_s24, 4  ;;  %s98_s28 = sshll.u32 %s251_s3, 4  ;;  %vm89_vm1 = vcmask 523264   ;;  %s97_s25 = int_to_ptr.vmem [resolvable:$true] %s96_s25  ;;  %s99_s28 = int_to_ptr.hbm [resolvable:$true] %s98_s28 }
   0xe   :  { %v48_v5 = vld [vmem:[#allocation2 + $0x8] sm:$0xff]  ;;  %v123_v6 = vld [vmem:[%s250_s2] ss:$0 sm:$0xff] }
   0xf   :  { %77 = vmatpush.msra.mxu0 %v51_v1  ;;  %115 = vmatpush.msra.mxu1 %v51_v1 }
  0x11   :  { %78 = vmatpush.msra.mxu0 %v50_v2  ;;  %116 = vmatpush.msra.mxu1 %v50_v2 }
  0x13   :  { %79 = vmatpush.msra.mxu0 %v49_v3  ;;  %117 = vmatpush.msra.mxu1 %v49_v3 }
  0x14   :  { %112 = vmatmul.msk.f32.vlgmr.msra.gmra.mxu0 %vm57_vm0, %v47_v4  ;;  %113 = vmatmul.msk.f32.vlgmr.msra.gmra.mxu1 %vm57_vm0, %v48_v5 }
  0x91   :  { %v81_v7 = vpop.f32.mrf.mxu0  ;;  %v84_v8 = vpop.f32.mrf.mxu1 }
  0x92   :  { %v82_v9 = vadd.f32 %v123_v6, %v81_v7  ;;  %v85_v10 = vadd.f32 %v123_v6, %v84_v8 }
  0x94   :  { %v87_v11 = vmax.f32 %v82_v9, 0.0  ;;  %v88_v12 = vmax.f32 %v85_v10, 0.0 }
  0x96   :  { %90 = vst.msk [vmem:[#allocation7] sm:$0xff] %vm89_vm1, %v87_v11 }
  0x97   :  { %91 = vst.msk [vmem:[#allocation7 + $0x8] sm:$0xff] %vm89_vm1, %v88_v12 }
  0x98   :  { %104 = dma.vmem_to_hbm [thread:$0]  %s97_s25, 256, %s99_s28, [#allocation4], %s203_s20, %s203_s20, %s204_s21  }
  0x99   :  { %200 = dma.done.wait [#allocation4], 256  }
  0x9a   :  { %201 = vsyncadd [#allocation4], 4294967040 }
  0x9b   :  { %109 = vsyncpa [#allocation3], 1 }
  0x9c   :  { %110 = vsyncpa [#allocation6], 1 }
  0x9d   :  { %111 = vsyncpa [#allocation4], 1 }

</bundles_post_ra>
